<compile_context>
chip_gen: v5e
topology: v5e:2x2
jax: 0.10.0
libtpu: 0.0.40
codegen_flags: <defaults>
</compile_context>

<pallas_src>
import functools

import jax
import jax.numpy as jnp
from jax.experimental import pallas as pl
from jax.experimental.pallas import tpu as pltpu


def _round_up(x, m):
    return (x + m - 1) // m * m


def _vmem_budget_bytes():
    """Generation-aware VMEM request ceiling (leave headroom for Mosaic scratch)."""
    try:
        cap = pltpu.get_tpu_info().vmem_capacity_bytes
    except Exception:
        cap = 64 * 1024 * 1024  # conservative fallback (works on every generation)
    if cap >= 128 * 1024 * 1024:                     # v5e / v6e: 128 MiB physical
        return 112 * 1024 * 1024
    return min(cap, 64 * 1024 * 1024) - 8 * 1024 * 1024   # v7x: never the full 64 MiB


def _choose_feature_tiling(p_min, w_itemsize, w_block_budget):
    """Pick padded feature width P (multiple of 128) and weight N-tile width tn.

    Returns (P, tn, n_tiles) with P == tn * n_tiles and the double-buffered
    (P, tn) weight block fitting in w_block_budget (or the tn == 128 floor).
    """
    n_tiles = 1
    while True:
        tn = _round_up(-(-p_min // n_tiles), 128)
        P = tn * n_tiles
        if 2 * P * tn * w_itemsize <= w_block_budget or tn == 128:
            return P, tn, n_tiles
        n_tiles += 1


def prepare_mlp_params(params, *, compute_dtype=jnp.bfloat16,
                       max_weight_block_bytes=None):
    """One-time parameter prep (hoisted out of the hot path).

    Pads every layer's (in, out) weight to a common lane-dense (P, P), stacks
    them as (L, P, P) in `compute_dtype`, and stacks biases as (L, 1, P) f32.
    Zero padding keeps padded activation columns exactly zero through every
    layer, so results are exact.

    Returns (w_stack, b_stack, cfg) with cfg = (hidden_dim, tn, n_tiles), a
    hashable static config to pass to mlp_forward.
    """
    d_in = params[0][0].shape[0]
    hidden = params[0][0].shape[1]
    w_itemsize = jnp.dtype(compute_dtype).itemsize

    p_min = max(_round_up(d_in, 128), _round_up(hidden, 128))
    budget = _vmem_budget_bytes()
    w_block_budget = (max_weight_block_bytes if max_weight_block_bytes is not None
                      else int(budget * 0.45))
    P, tn, n_tiles = _choose_feature_tiling(p_min, w_itemsize, w_block_budget)

    ws, bs = [], []
    for w, b in params:
        w = jnp.asarray(w, compute_dtype)
        b = jnp.asarray(b, jnp.float32)
        ws.append(jnp.pad(w, ((0, P - w.shape[0]), (0, P - w.shape[1]))))
        bs.append(jnp.pad(b, ((0, P - b.shape[0]),)).reshape(1, P))
    w_stack = jnp.stack(ws)                      # (L, P, P)  compute_dtype
    b_stack = jnp.stack(bs)                      # (L, 1, P)  f32
    return w_stack, b_stack, (hidden, tn, n_tiles)


def _fused_mlp_kernel(x_ref, w_ref, b_ref, o_ref):
    """grid = (M_tiles, L). Cross-layer carry lives in the resident output block.

    x_ref: (tm, P)  input tile (compute dtype), read only at layer 0
    w_ref: (1, P, P) this layer's weight, streamed (double-buffered) per step
    b_ref: (L, 1, P) full bias stack, VMEM-resident (constant index_map)
    o_ref: (tm, P)  output block — same block index across the layer axis, so it
                    stays in VMEM and carries the activation between layers.
    """
    layer = pl.program_id(1)

    @pl.when(layer == 0)
    def _():
        o_ref[...] = x_ref[...].astype(o_ref.dtype)

    h = o_ref[...].astype(w_ref.dtype)
    acc = jnp.dot(h, w_ref[0], preferred_element_type=jnp.float32)
    acc = acc + b_ref[layer].astype(jnp.float32)          # (1, P) resident bias row
    # TODO(synk): train-mode dropout mask (pltpu.prng_random_bits) would go here.
    o_ref[...] = jnp.maximum(acc, 0.0).astype(o_ref.dtype)


def _fused_mlp_ntiled_kernel(x_ref, w_ref, b_ref, o_ref, h_ref, *, tn):
    """grid = (M_tiles, L, N_tiles): weight streamed in (P, tn) column tiles.

    h_ref carries the previous layer's full (tm, P) activation; each (l, n) step
    writes columns [n*tn, (n+1)*tn) of layer l's activation into the resident
    output block, which is copied back into h_ref once per layer.
    """
    layer = pl.program_id(1)
    n = pl.program_id(2)
    n_layers = pl.num_programs(1)
    n_tiles = pl.num_programs(2)

    @pl.when((layer == 0) & (n == 0))
    def _():
        h_ref[...] = x_ref[...].astype(h_ref.dtype)

    acc = jnp.dot(h_ref[...], w_ref[0], preferred_element_type=jnp.float32)
    acc = acc + b_ref[0].astype(jnp.float32)              # (1, tn) bias tile
    h_new = jnp.maximum(acc, 0.0)
    # TODO(synk): train-mode dropout mask would be applied to h_new here.

    col0 = pl.multiple_of(n * tn, 128)
    o_ref[:, pl.ds(col0, tn)] = h_new.astype(o_ref.dtype)

    @pl.when((n == n_tiles - 1) & (layer < n_layers - 1))
    def _():
        h_ref[...] = o_ref[...].astype(h_ref.dtype)


@functools.partial(jax.jit, static_argnames=("cfg",))
def mlp_forward(x, w_stack, b_stack, *, cfg):
    """(Linear -> ReLU -> Dropout[eval=identity]) x L, fused in one pallas_call."""
    hidden, tn, n_tiles = cfg
    num_layers, P, _ = w_stack.shape
    batch, d_in = x.shape

    compute_dtype = w_stack.dtype
    w_item = jnp.dtype(compute_dtype).itemsize
    x_item = w_item                                # x is cast to the compute dtype
    out_item = jnp.dtype(x.dtype).itemsize
    sub = 16 if w_item < 4 else 8                  # bf16 sublane packing

    # ---- M tiling: big tiles past the weight-stream ridge; >=2 tiles for megacore.
    m_min = _round_up(batch, sub)
    if m_min > 512:
        tm = 512
    elif m_min >= 256:
        tm = _round_up(-(-m_min // 2), sub)        # split so both TensorCores work
    else:
        tm = m_min

    budget = _vmem_budget_bytes()

    def vmem_use(tm_):
        w = 2 * P * tn * w_item                    # double-buffered weight block
        xb = 2 * tm_ * P * x_item                  # x block
        ob = 2 * tm_ * P * out_item                # output block (carry)
        if n_tiles == 1:
            extra = num_layers * P * 4             # resident bias stack
        else:
            extra = 2 * tn * 4 + tm_ * P * w_item  # streamed bias + carry scratch
        return w + xb + ob + extra

    while tm > sub and vmem_use(tm) > budget:
        tm = _round_up(tm // 2, sub)
    assert vmem_use(tm) <= budget, (
        f"fused MLP tile does not fit VMEM even at tm={tm} "
        f"({vmem_use(tm)} > {budget} bytes)")

    m_pad = _round_up(batch, tm)
    m_tiles = m_pad // tm
    x_pad = jnp.pad(x.astype(compute_dtype), ((0, m_pad - batch), (0, P - d_in)))

    vmem_limit = int(min(budget,
                         max(32 * 1024 * 1024, vmem_use(tm) + 4 * 1024 * 1024)))

    cost = pl.CostEstimate(
        flops=2 * m_pad * P * P * num_layers,
        transcendentals=0,
        bytes_accessed=int(
            m_pad * P * x_item
            + m_tiles * num_layers * P * P * w_item   # weights re-streamed per M tile
            + num_layers * P * 4
            + m_pad * P * out_item),
    )

    if n_tiles == 1:
        grid = (m_tiles, num_layers)
        in_specs = [
            pl.BlockSpec((tm, P), lambda m, l: (m, 0)),
            pl.BlockSpec((1, P, P), lambda m, l: (l, 0, 0)),
            pl.BlockSpec((num_layers, 1, P), lambda m, l: (0, 0, 0)),  # resident bias
        ]
        out_spec = pl.BlockSpec((tm, P), lambda m, l: (m, 0))
        scratch = []
        kernel = _fused_mlp_kernel
        dims = ("parallel", "arbitrary")
    else:
        grid = (m_tiles, num_layers, n_tiles)
        in_specs = [
            pl.BlockSpec((tm, P), lambda m, l, n: (m, 0)),
            pl.BlockSpec((1, P, tn), lambda m, l, n: (l, 0, n)),
            pl.BlockSpec((1, 1, tn), lambda m, l, n: (l, 0, n)),
        ]
        out_spec = pl.BlockSpec((tm, P), lambda m, l, n: (m, 0))
        scratch = [pltpu.VMEM((tm, P), compute_dtype)]
        kernel = functools.partial(_fused_mlp_ntiled_kernel, tn=tn)
        dims = ("parallel", "arbitrary", "arbitrary")

    out_pad = pl.pallas_call(
        kernel,
        out_shape=jax.ShapeDtypeStruct((m_pad, P), x.dtype),
        grid_spec=pltpu.PrefetchScalarGridSpec(
            num_scalar_prefetch=0,
            grid=grid,
            in_specs=in_specs,
            out_specs=out_spec,
            scratch_shapes=scratch,
        ),
        compiler_params=pltpu.CompilerParams(
            dimension_semantics=dims,
            vmem_limit_bytes=vmem_limit,
        ),
        cost_estimate=cost,
    )(x_pad, w_stack, b_stack)

    return out_pad[:batch, :hidden]


def init_mlp_params(key, input_dim, hidden_dim, num_layers, dtype=jnp.float32):
    """Deterministic init matching nn.Linear's U(-1/sqrt(fan_in), 1/sqrt(fan_in)).

    Weights are stored as (in_features, out_features) so the kernel computes x @ W.
    """
    params = []
    for i in range(num_layers):
        layer_in = input_dim if i == 0 else hidden_dim
        key, kw, kb = jax.random.split(key, 3)
        bound = 1.0 / (layer_in ** 0.5)
        w = jax.random.uniform(kw, (layer_in, hidden_dim), dtype, -bound, bound)
        b = jax.random.uniform(kb, (hidden_dim,), dtype, -bound, bound)
        params.append((w, b))
    return params


if __name__ == "__main__":
    key = jax.random.PRNGKey(0)

    def ref_mlp(x, params):  # plain-JAX reference (eval-mode dropout == identity)
        h = x
        for w, b in params:
            h = jnp.maximum(h @ w + b, 0.0)
        return h

    # --- Case 1: default bf16 compute, full-width fused weights. -------------
    batch, input_dim, hidden_dim, num_layers = 2, 16, 32, 3
    dropout_prob = 0.1  # identity at inference
    k1, k2, key = jax.random.split(key, 3)
    x = jax.random.normal(k1, (batch, input_dim), dtype=jnp.float32)
    params = init_mlp_params(k2, input_dim, hidden_dim, num_layers)
    ref = ref_mlp(x, params)

    w_stack, b_stack, cfg = prepare_mlp_params(params)          # bf16 by default
    out = mlp_forward(x, w_stack, b_stack, cfg=cfg)
    jax.block_until_ready(out)
    assert out.shape == (batch, hidden_dim)
    assert jnp.allclose(out, ref, atol=5e-2, rtol=1e-1)

    # --- Case 2: f32 compute path is exact. ----------------------------------
    w32, b32, cfg32 = prepare_mlp_params(params, compute_dtype=jnp.float32)
    out32 = mlp_forward(x, w32, b32, cfg=cfg32)
    jax.block_until_ready(out32)
    assert out32.shape == (batch, hidden_dim)
    assert jnp.allclose(out32, ref, atol=1e-5, rtol=1e-5)

    # --- Case 3: weight N-tiling path (forced small weight-block budget). ----
    batch3, in3, hid3, L3 = 4, 40, 256, 2
    k3, k4 = jax.random.split(key)
    x3 = jax.random.normal(k3, (batch3, in3), dtype=jnp.float32)
    params3 = init_mlp_params(k4, in3, hid3, L3)
    ref3 = ref_mlp(x3, params3)
    w3, b3, cfg3 = prepare_mlp_params(params3, max_weight_block_bytes=150_000)
    assert cfg3[2] > 1, "expected the N-tiled weight path"
    out3 = mlp_forward(x3, w3, b3, cfg=cfg3)
    jax.block_until_ready(out3)
    assert out3.shape == (batch3, hid3)
    assert jnp.allclose(out3, ref3, atol=5e-2, rtol=1e-1)

    print("KERNEL_OK")
</pallas_src>

<mosaic_0001>
module attributes {stable_mosaic.version = 11 : i64} {
  func.func @_fused_mlp_kernel(%arg0: i32, %arg1: i32, %arg2: memref<16x128xbf16, #tpu.memory_space<vmem>>, %arg3: memref<1x128x128xbf16, #tpu.memory_space<vmem>>, %arg4: memref<3x1x128xf32, #tpu.memory_space<vmem>>, %arg5: memref<16x128xf32, #tpu.memory_space<vmem>>) attributes {dimension_semantics = [#tpu.dimension_semantics<parallel>, #tpu.dimension_semantics<arbitrary>], iteration_bounds = array<i64: 1, 3>, scalar_prefetch = 0 : i64, scratch_operands = 0 : i64, tpu.core_type = #tpu.core_type<tc>, window_params = [{transform_indices = @transform_0, window_bounds = array<i64: 16, 128>}, {transform_indices = @transform_1, window_bounds = array<i64: 1, 128, 128>}, {pipeline_mode = #tpu.pipeline_mode<synchronous>, transform_indices = @transform_2, window_bounds = array<i64: 3, 1, 128>}, {transform_indices = @transform_3, window_bounds = array<i64: 16, 128>}]} {
    %c0_i32 = arith.constant 0 : i32
    %0 = arith.cmpi eq, %arg1, %c0_i32 : i32
    %1 = arith.extui %0 : i1 to i32
    %c0_i32_0 = arith.constant 0 : i32
    %2 = arith.cmpi ne, %1, %c0_i32_0 : i32
    scf.if %2 {
      %c0_10 = arith.constant 0 : index
      %c0_11 = arith.constant 0 : index
      %16 = vector.load %arg2[%c0_10, %c0_11] : memref<16x128xbf16, #tpu.memory_space<vmem>>, vector<16x128xbf16>
      %17 = arith.extf %16 : vector<16x128xbf16> to vector<16x128xf32>
      %c0_12 = arith.constant 0 : index
      %c0_13 = arith.constant 0 : index
      %18 = vector.load %arg5[%c0_12, %c0_13] : memref<16x128xf32, #tpu.memory_space<vmem>>, vector<16x128xf32>
      tpu.vector_store %arg5[%c0_12, %c0_13], %17 {strides = array<i32>} : memref<16x128xf32, #tpu.memory_space<vmem>>, vector<16x128xf32>,
    } else {
    }
    %c0 = arith.constant 0 : index
    %c0_1 = arith.constant 0 : index
    %3 = vector.load %arg5[%c0, %c0_1] : memref<16x128xf32, #tpu.memory_space<vmem>>, vector<16x128xf32>
    %4 = arith.truncf %3 : vector<16x128xf32> to vector<16x128xbf16>
    %c0_2 = arith.constant 0 : index
    %c0_3 = arith.constant 0 : index
    %c0_4 = arith.constant 0 : index
    %5 = vector.load %arg3[%c0_2, %c0_3, %c0_4] : memref<1x128x128xbf16, #tpu.memory_space<vmem>>, vector<1x128x128xbf16>
    %6 = vector.shape_cast %5 : vector<1x128x128xbf16> to vector<128x128xbf16>
    %cst = arith.constant dense<0.000000e+00> : vector<16x128xf32>
    %7 = tpu.matmul %4, %6, %cst {dimension_numbers = #tpu.dot_dimension_numbers<[1], [0], [0], [1], [0, 0, 1, 1], [], []>} : vector<16x128xbf16>, vector<128x128xbf16>, vector<16x128xf32> -> vector<16x128xf32>
    %8 = arith.index_cast %arg1 : i32 to index
    %c0_5 = arith.constant 0 : index
    %c0_6 = arith.constant 0 : index
    %9 = vector.load %arg4[%8, %c0_5, %c0_6] : memref<3x1x128xf32, #tpu.memory_space<vmem>>, vector<1x1x128xf32>
    %10 = vector.shape_cast %9 : vector<1x1x128xf32> to vector<1x128xf32>
    %11 = vector.broadcast %10 : vector<1x128xf32> to vector<16x128xf32>
    %12 = arith.addf %7, %11 : vector<16x128xf32>
    %cst_7 = arith.constant 0.000000e+00 : f32
    %13 = vector.broadcast %cst_7 : f32 to vector<16x128xf32>
    %14 = arith.maximumf %12, %13 : vector<16x128xf32>
    %c0_8 = arith.constant 0 : index
    %c0_9 = arith.constant 0 : index
    %15 = vector.load %arg5[%c0_8, %c0_9] : memref<16x128xf32, #tpu.memory_space<vmem>>, vector<16x128xf32>
    tpu.vector_store %arg5[%c0_8, %c0_9], %14 {strides = array<i32>} : memref<16x128xf32, #tpu.memory_space<vmem>>, vector<16x128xf32>,
    return
  }
  func.func @transform_0(%arg0: i32, %arg1: i32) -> (i32, i32) {
    %c0_i32 = arith.constant 0 : i32
    %c0_i32_0 = arith.constant 0 : i32
    return %arg0, %c0_i32 : i32, i32
  }
  func.func @transform_1(%arg0: i32, %arg1: i32) -> (i32, i32, i32) {
    %c0_i32 = arith.constant 0 : i32
    %c0_i32_0 = arith.constant 0 : i32
    %c0_i32_1 = arith.constant 0 : i32
    return %arg1, %c0_i32, %c0_i32_0 : i32, i32, i32
  }
  func.func @transform_2(%arg0: i32, %arg1: i32) -> (i32, i32, i32) {
    %c0_i32 = arith.constant 0 : i32
    %c0_i32_0 = arith.constant 0 : i32
    %c0_i32_1 = arith.constant 0 : i32
    %c0_i32_2 = arith.constant 0 : i32
    return %c0_i32, %c0_i32_0, %c0_i32_1 : i32, i32, i32
  }
  func.func @transform_3(%arg0: i32, %arg1: i32) -> (i32, i32) {
    %c0_i32 = arith.constant 0 : i32
    %c0_i32_0 = arith.constant 0 : i32
    return %arg0, %c0_i32 : i32, i32
  }
}

</mosaic_0001>

<bundles_post_ra>
// kernel: mlp_forward.1
= control target key start
LH: loop header
LB: loop body
LE: loop exit
PB: predicated region body
PF: predicated region fallthrough
CT: control target
= control target key end

     0   :  { %8 = vsyncpa [#allocation3], 0  ;;  %s747_s0 = inlined_call_operand.vmem [shape: bf16[16,128], index: 0, kind: input, shape index: {}]   ;;  %s748_s1 = inlined_call_operand.hbm [shape: bf16[3,128,128], index: 1, kind: input, shape index: {}]   ;;  %s749_s2 = inlined_call_operand.vmem [shape: f32[3,1,128], index: 2, kind: input, shape index: {}]   ;;  %s750_s3 = inlined_call_operand.vmem [shape: f32[16,128], index: 3, kind: output, shape index: {}]  }
   0x1   :  { %10 = vsyncpa [#allocation3 + $0x1], 0  ;;  %s638_s12 = smov 0   ;;  %s640_s13 = smov 0  }
   0x2   :  { %s642_s14 = smov 0   ;;  %s644_s15 = smov 0  }
   0x3   :  { %s646_s16 = smov 0   ;;  %s648_s17 = smov 0  }
   0x4 LB: > { %s417_s18 = sadd.s32 4294967295, %s614_s17   ;;  %s25_s19 = sadd.s32 1, %s610_s16  ;;  %s614_s17 = sphi %s648_s17, %s16_s17   ;;  %s610_s16 = sphi %s646_s16, %s757_s16   ;;  %s606_s15 = sphi %s644_s15, %s756_s15   ;;  %s602_s14 = sphi %s642_s14, %s755_s14   ;;  %s598_s13 = sphi %s640_s13, %s754_s13   ;;  %s594_s12 = sphi %s638_s12, %s753_s12  }
   0x5   : > { %p26_p0 = scmp.ge.s32.totalorder %s25_s19, 3  ;;  %s61_s20 = sadd.s32 1, %s602_s14 }
   0x6   : > { %p68_p1 = scmp.ne.s32.totalorder %s602_s14, %s598_s13  ;;  %p69_p2 = scmp.eq.s32.totalorder %s614_s17, 0 }
   0x7   : > { %s759_s19 = smov (%p26_p0, %s25_s19), 0  ;;  %p74_p4 = scmp.ne.s32.totalorder %s598_s13, %s594_s12 }
   0x8   : > { %p674_p3 = por %p69_p2, %p68_p1  ;;  %s58_s22 = ssub.s32 %s610_s16, %s759_s19 }
   0x9   : > { %p75_p5 = scmp.eq.s32.totalorder %s417_s18, 0  ;;  %p59_p6 = scmp.eq.s32.totalorder %s58_s22, 0 }
   0xa   : > { %p482_p8 = scmp.lt.s32.totalorder %s614_s17, 3  ;;  %s157_s25 = sand.u32 1, %s602_s14  }
   0xb   : > { %p681_p7 = por %p75_p5, %p74_p4  ;;  %s463_s26 = sshll.u32 %s610_s16, 6 }
   0xc   : > { %s687_s24 = scalar_select %p59_p6, %s602_s14, %s61_s20  }
   0xd   : > { %s421_s27 = sshll.u32 %s157_s25, 6  ;;  %s166_s30 = scalar_lea.hbm %s748_s1, %s463_s26 }
   0xe   : > { %s167_s4 = sshll.u32 %s166_s30, 4  ;;  %s161_s5 = scalar_lea.vmem [#allocation2], %s421_s27  ;;  %s168_s4 = int_to_ptr.hbm [resolvable:$true] %s167_s4 }
   0xf   : > { %s169_s6 = sshll.u32 %s161_s5, 4  ;;  %p479_p9 = pnand %p482_p8, %p674_p3  ;;  %s170_s6 = int_to_ptr.vmem [resolvable:$true] %s169_s6 }
  0x10   : > { %p424_p10 = scmp.ge.s32.totalorder %s614_s17, 1  ;;  %p177_p11 = scmp.lt.s32.totalorder %s614_s17, 4 }
  0x11   : > { %s158_s7 = scalar_lea.sflag [#allocation3], %s157_s25  ;;  %s616_s8 = smov 64  }
  0x12   : > { %s617_s9 = smov 4   ;;  %p178_p12 = pnand %p424_p10, %p177_p11 }
  0x13   : > { %481 = dma.hbm_to_vmem [thread:$0]  (!%p479_p9), %s168_s4, 1024, %s170_s6, %s158_s7, %s616_s8, %s616_s8, %s617_s9  }
  0x14   : > { %181 = sbr.rel (%p178_p12) target bundleno = 209 (0xd1), region = 32  ;;  %s183_s10 = sand.u32 (!%p178_p12), 1, %s598_s13  }
  0x15   : > { %s425_s11 = sshll.u32 (!%p178_p12), %s183_s10, 6  ;;  %s184_s12 = scalar_lea.sflag (!%p178_p12), [#allocation3], %s183_s10 }
  0x16   : > { %s187_s18 = scalar_lea.vmem (!%p178_p12), [#allocation2], %s425_s11 }
  0x19   : > { %589 = dma.done.wait (%p681_p7), %s184_s12, 1024  }
  0x1a   : > { %591 = vsyncadd (%p681_p7), %s184_s12, 4294966272  ;;  %p426_p13 = scmp.ne.s32.totalorder %s606_s15, 0 }
  0x1c   : > { %231 = sbr.rel (%p426_p13) target bundleno = 38 (0x26), region = 40 }
  0x21   : > { %v473_v0 = vld [vmem:[%s747_s0] sm:$0xff]  }
  0x22   : > { %v474_v1 = vunpack.c.l.bf16 %v473_v0  ;;  %v475_v2 = vunpack.c.h.bf16 %v473_v0 }
  0x24   : > { %236 = vst [vmem:[%s750_s3] sm:$0xff] %v474_v1 }
  0x25   : > { %237 = vst [vmem:[%s750_s3 + $0x8] sm:$0xff] %v475_v2 }
  0x26 PF: > { %v471_v3 = vld [vmem:[%s187_s18 + $0x38] sm:$0xff]  ;;  %v470_v4 = vld [vmem:[%s187_s18 + $0x30] sm:$0xff]  ;;  %s257_s29 = scalar_lea.vmem %s749_s2, %s606_s15  ;;  %v469_v5 = vld [vmem:[%s187_s18 + $0x28] sm:$0xff] }
  0x27   : > { %310 = vmatpush.bf16.msra.mxu0 %v471_v3  ;;  %v468_v6 = vld [vmem:[%s187_s18 + $0x20] sm:$0xff]  ;;  %v467_v7 = vld [vmem:[%s187_s18 + $0x18] sm:$0xff]  ;;  %v466_v8 = vld [vmem:[%s187_s18 + $0x10] sm:$0xff] }
  0x28   : > { %v465_v9 = vld [vmem:[%s187_s18 + $0x8] sm:$0xff]  ;;  %v464_v10 = vld [vmem:[%s187_s18] sm:$0xff] }
  0x29   : > { %v533_v14 = vld [vmem:[%s257_s29] ss:$0 sm:$0xff] }
  0x2b   : > { %311 = vmatpush.bf16.msra.mxu0 %v470_v4  ;;  %v238_v11 = vld [vmem:[%s750_s3] sm:$0xff] }
  0x2c   : > { %v239_v12 = vld [vmem:[%s750_s3 + $0x8] sm:$0xff] }
  0x2d   : > { %v240_v13 = vpack.c.bf16 %v239_v12, %v238_v11 }
  0x2f   : > { %312 = vmatpush.bf16.msra.mxu0 %v469_v5 }
  0x33   : > { %313 = vmatpush.bf16.msra.mxu0 %v468_v6 }
  0x37   : > { %314 = vmatpush.bf16.msra.mxu0 %v467_v7 }
  0x3b   : > { %315 = vmatpush.bf16.msra.mxu0 %v466_v8 }
  0x3f   : > { %316 = vmatpush.bf16.msra.mxu0 %v465_v9 }
  0x43   : > { %317 = vmatpush.bf16.msra.mxu0 %v464_v10 }
  0x46   : > { %318 = vmatmul.bf16.vlgmr.msra.gmra.mxu0 %v240_v13 }
  0xc3   : > { %v319_v15 = vpop.f32.mrf.mxu0 }
  0xc4   : > { %v320_v16 = vadd.f32 %v533_v14, %v319_v15 }
  0xc6   : > { %v324_v17 = vmax.f32 %v320_v16, 0.0 }
  0xc8   : > { %326 = vst [vmem:[%s750_s3] sm:$0xff] %v324_v17 }
  0xcb   : > { %v321_v18 = vpop.f32.mrf.mxu0 }
  0xcc   : > { %v322_v19 = vadd.f32 %v533_v14, %v321_v18 }
  0xce   : > { %v325_v20 = vmax.f32 %v322_v19, 0.0 }
  0xd0   : > { %327 = vst [vmem:[%s750_s3 + $0x8] sm:$0xff] %v325_v20 }
  0xd1 PF: > { %s16_s17 = sadd.s32 1, %s614_s17   ;;  %s753_s12 = smov %s598_s13 }
  0xd2   : > { %p13_p0 = scmp.ge.s32.totalorder %s16_s17, 5   ;;  %s754_s13 = smov %s602_s14 }
  0xd3   : > { %s755_s14 = smov %s687_s24  ;;  %s756_s15 = smov %s610_s16 }
  0xd4   : > { %s757_s16 = smov %s759_s19  ;;  %15 = sbr.rel (!%p13_p0) target bundleno = 4 (0x4), region = 80 }
  0xd9   :  { %350 = vsyncpa [#allocation3], 1 }
  0xda   :  { %352 = vsyncpa [#allocation3 + $0x1], 1 }

</bundles_post_ra>
